<compile_context>
chip_gen: v7x
topology: tpu7x:2x2x1
jax: 0.10.0
libtpu: 0.0.40
codegen_flags: <defaults>
</compile_context>

<pallas_src>
import jax
import jax.numpy as jnp
from jax.experimental import pallas as pl
from jax.experimental.pallas import tpu as pltpu

EPS = 1e-6


def _cdiv(a, b):
    return -(-a // b)


def _round_up(a, m):
    return _cdiv(a, m) * m


def _vmem_capacity_bytes():
    try:
        cap = int(getattr(pltpu.get_tpu_info(), "vmem_capacity_bytes", 0))
        if cap > 0:
            return cap
    except Exception:
        pass
    return 64 << 20  # v7x per-TensorCore physical VMEM; safe lower bound


def dice_loss(input_nchw, target_nhw, reduction=None, compute_dtype=jnp.float32):
    """Sørensen–Dice loss (softmax over C, one-hot target), one value per sample.

    input_nchw: (N, C, H, W) float (f32 or bf16; fed to the kernel as-is).
    target_nhw: (N, H, W) integer class labels in [0, C).
    """
    N, C, H, W = input_nchw.shape
    assert target_nhw.shape == (N, H, W)
    HW = H * W

    # Labels as int8 when classes fit -> 4x less label HBM traffic.
    t_dtype = jnp.int8 if C <= 127 else jnp.int32
    x_flat = input_nchw.reshape(N, C, HW)            # native dtype, no f32 upcast
    t_flat = target_nhw.reshape(N, HW).astype(t_dtype)

    s_total = _cdiv(HW, 128)                          # 128-pixel lane rows

    # ---- generation-aware VMEM budget -> spatial tile size ------------------
    phys = _vmem_capacity_bytes()
    if phys >= (100 << 20):                 # v5e / v6e: 128 MiB physical
        vmem_limit = 96 << 20
    else:                                   # v7x: 64 MiB per TensorCore
        vmem_limit = min(40 << 20, (phys * 3) // 5)
    budget = (2 * vmem_limit) // 3          # headroom for compiler scratch etc.

    x_bytes = jnp.dtype(input_nchw.dtype).itemsize
    t_bytes = jnp.dtype(t_dtype).itemsize
    # Steady-state bytes per 128-lane sublane row of a spatial tile:
    # double-buffered x/label input tiles + ~8 row-shaped f32 temporaries.
    bytes_per_row = 128 * (2 * N * C * x_bytes + 2 * N * t_bytes) + 8 * N * 512
    ROW_ALIGN = 32                          # int8 labels pack 32 sublanes; bf16 x packs 16
    max_rows = max(ROW_ALIGN, (budget // bytes_per_row) // ROW_ALIGN * ROW_ALIGN)

    if HW == s_total * 128 and s_total <= max(8, min(2 * ROW_ALIGN, max_rows)):
        # Tiny input: one full-extent spatial block, no padding / alignment.
        s_tile, kb_total = s_total, 1
    else:
        # Budget-driven tile; tail handled by wrapper padding (not a divisor
        # search), and an even tile count so both v7x TensorCores get work.
        s_tile = min(max_rows, _round_up(_cdiv(s_total, 2), ROW_ALIGN))
        kb_total = _cdiv(s_total, s_tile)
        if kb_total > 1 and kb_total % 2:
            kb_total += 1

    P = 2 if (kb_total >= 2 and kb_total % 2 == 0) else 1
    KB = kb_total // P
    pix_pad = kb_total * s_tile * 128
    if pix_pad != HW:
        # Padded pixels: x = 0, label = -1 (matches no class) -> they add
        # exactly 0 to the intersection; the union term uses the true HW.
        x_flat = jnp.pad(x_flat, ((0, 0), (0, 0), (0, pix_pad - HW)))
        t_flat = jnp.pad(t_flat, ((0, 0), (0, pix_pad - HW)), constant_values=-1)
    x = x_flat.reshape(N, C, kb_total * s_tile, 128)
    t = t_flat.reshape(N, kb_total * s_tile, 128)

    ACC_R = 8 if s_tile % 8 == 0 else s_tile      # vreg-shaped accumulator rows
    CH = s_tile // ACC_R

    def kernel(x_ref, t_ref, part_ref, acc_ref):
        k = pl.program_id(1)

        @pl.when(k == 0)
        def _():
            acc_ref[...] = jnp.zeros_like(acc_ref)

        labels = t_ref[...].astype(jnp.int32)                    # (N, S, 128)

        # Running max over the class axis: one class slice live at a time,
        # so no (N, C, S, 128) f32 temporaries (keeps vregs from spilling).
        m = x_ref[:, 0].astype(compute_dtype)
        for c in range(1, C):
            m = jnp.maximum(m, x_ref[:, c].astype(compute_dtype))

        # Fused softmax + one-hot select, class by class:
        #   inter_pix = exp(x[label] - m) / sum_c exp(x_c - m)
        denom = jnp.zeros((N, s_tile, 128), jnp.float32)
        num = jnp.zeros((N, s_tile, 128), jnp.float32)
        for c in range(C):          # static unroll; fine for segmentation-sized C
            ec = jnp.exp(x_ref[:, c].astype(compute_dtype) - m).astype(jnp.float32)
            denom = denom + ec
            num = num + jnp.where(labels == c, ec, 0.0)

        # EUP approx reciprocal + one Newton step: avoids the multi-op f32
        # divide lowering while staying ~f32 accurate.
        r = pl.reciprocal(denom, approx=True)
        r = r * (2.0 - denom * r)
        inter = num * r                                          # (N, S, 128)

        if CH > 1:
            # Fold to one vreg row-block per sample (cross-vreg VPU adds);
            # keeps the accumulator + its per-step load/store traffic tiny.
            inter = inter.reshape(N, CH, ACC_R, 128).sum(axis=1)
        acc_ref[...] += inter

        @pl.when(k == pl.num_programs(1) - 1)
        def _():
            # Single deferred cross-sublane reduce (XLU), once per p chunk.
            part_ref[0] = jnp.sum(acc_ref[...], axis=1)          # (N, 128)

    part = pl.pallas_call(
        kernel,
        out_shape=jax.ShapeDtypeStruct((P, N, 128), jnp.float32),
        grid_spec=pltpu.PrefetchScalarGridSpec(
            num_scalar_prefetch=0,
            grid=(P, KB),
            in_specs=[
                pl.BlockSpec((N, C, s_tile, 128),
                             lambda p, k: (0, 0, p * KB + k, 0)),
                pl.BlockSpec((N, s_tile, 128),
                             lambda p, k: (0, p * KB + k, 0)),
            ],
            out_specs=pl.BlockSpec((1, N, 128), lambda p, k: (p, 0, 0)),
            scratch_shapes=[pltpu.VMEM((N, ACC_R, 128), jnp.float32)],
        ),
        compiler_params=pltpu.CompilerParams(
            dimension_semantics=("parallel", "arbitrary"),
            vmem_limit_bytes=vmem_limit,
        ),
        cost_estimate=pl.CostEstimate(
            flops=(6 * C + 6) * N * pix_pad,
            transcendentals=(C + 1) * N * pix_pad,
            bytes_accessed=(C * x_bytes + t_bytes) * N * pix_pad + 4 * P * N * 128,
        ),
    )(x, t)

    inter_per_sample = jnp.sum(part, axis=(0, 2))                # (N,)
    union = 2.0 * HW            # analytic: softmax and one-hot each sum to 1
    loss = 1.0 - 2.0 * inter_per_sample / (union + EPS)

    if reduction == "mean":
        return jnp.mean(loss)
    if callable(reduction):
        return reduction(loss)
    return loss


def _reference(x, target, num_classes):
    # pure-JAX reference (intended semantics of the PyTorch module)
    p = jax.nn.softmax(x, axis=1)
    oh = jnp.transpose(jax.nn.one_hot(target, num_classes, dtype=jnp.float32),
                       (0, 3, 1, 2))
    inter = jnp.sum(p * oh, axis=(1, 2, 3))
    union = jnp.sum(p + oh, axis=(1, 2, 3))
    return 1.0 - 2.0 * inter / (union + EPS)


if __name__ == "__main__":
    key = jax.random.PRNGKey(0)
    k1, k2, k3, k4 = jax.random.split(key, 4)

    # primary shape: (N, C, H, W) / (N, H, W)
    N, C, H, W = 2, 4, 16, 16
    x = jax.random.normal(k1, (N, C, H, W), dtype=jnp.float32)
    target = jax.random.randint(k2, (N, H, W), 0, C, dtype=jnp.int32)

    out = jax.block_until_ready(dice_loss(x, target))
    ref = _reference(x, target, C)
    assert out.shape == (N,)
    assert jnp.allclose(out, ref, atol=1e-4, rtol=1e-4), (out, ref)

    # shape whose H*W is not a multiple of 128 -> exercises the padded /
    # tiled path (sentinel -1 labels, vreg-shaped accumulator fold).
    N2, C2, H2, W2 = 1, 3, 18, 18
    x2 = jax.random.normal(k3, (N2, C2, H2, W2), dtype=jnp.float32)
    target2 = jax.random.randint(k4, (N2, H2, W2), 0, C2, dtype=jnp.int32)
    out2 = jax.block_until_ready(dice_loss(x2, target2))
    ref2 = _reference(x2, target2, C2)
    assert jnp.allclose(out2, ref2, atol=1e-4, rtol=1e-4), (out2, ref2)

    print("KERNEL_OK")
</pallas_src>

<mosaic_0001>
module attributes {stable_mosaic.version = 11 : i64} {
  func.func @kernel(%arg0: i32, %arg1: i32, %arg2: memref<2x4x2x128xf32, #tpu.memory_space<vmem>>, %arg3: memref<2x2x128xi8, #tpu.memory_space<vmem>>, %arg4: memref<1x2x128xf32, #tpu.memory_space<vmem>>, %arg5: memref<2x2x128xf32, #tpu.memory_space<vmem>>) attributes {dimension_semantics = [#tpu.dimension_semantics<parallel>, #tpu.dimension_semantics<arbitrary>], iteration_bounds = array<i64: 1, 1>, scalar_prefetch = 0 : i64, scratch_operands = 1 : i64, tpu.core_type = #tpu.core_type<tc>, window_params = [{transform_indices = @transform_0, window_bounds = array<i64: 2, 4, 2, 128>}, {transform_indices = @transform_1, window_bounds = array<i64: 2, 2, 128>}, {transform_indices = @transform_2, window_bounds = array<i64: 1, 2, 128>}]} {
    %c0_i32 = arith.constant 0 : i32
    %0 = arith.cmpi eq, %arg1, %c0_i32 : i32
    %1 = arith.extui %0 : i1 to i32
    %c0_i32_0 = arith.constant 0 : i32
    %2 = arith.cmpi ne, %1, %c0_i32_0 : i32
    scf.if %2 {
      %cst_47 = arith.constant 0.000000e+00 : f32
      %70 = vector.broadcast %cst_47 : f32 to vector<2x2x128xf32>
      %c0_48 = arith.constant 0 : index
      %c0_49 = arith.constant 0 : index
      %c0_50 = arith.constant 0 : index
      %71 = vector.load %arg5[%c0_48, %c0_49, %c0_50] : memref<2x2x128xf32, #tpu.memory_space<vmem>>, vector<2x2x128xf32>
      tpu.vector_store %arg5[%c0_48, %c0_49, %c0_50], %70 {strides = array<i32>} : memref<2x2x128xf32, #tpu.memory_space<vmem>>, vector<2x2x128xf32>,
    } else {
    }
    %c0 = arith.constant 0 : index
    %c0_1 = arith.constant 0 : index
    %c0_2 = arith.constant 0 : index
    %3 = vector.load %arg3[%c0, %c0_1, %c0_2] : memref<2x2x128xi8, #tpu.memory_space<vmem>>, vector<2x2x128xi8>
    %4 = arith.extsi %3 : vector<2x2x128xi8> to vector<2x2x128xi32>
    %c0_3 = arith.constant 0 : index
    %c0_4 = arith.constant 0 : index
    %c0_5 = arith.constant 0 : index
    %c0_6 = arith.constant 0 : index
    %5 = vector.load %arg2[%c0_3, %c0_4, %c0_5, %c0_6] : memref<2x4x2x128xf32, #tpu.memory_space<vmem>>, vector<2x1x2x128xf32>
    %6 = vector.shape_cast %5 : vector<2x1x2x128xf32> to vector<2x2x128xf32>
    %c0_7 = arith.constant 0 : index
    %c1 = arith.constant 1 : index
    %c0_8 = arith.constant 0 : index
    %c0_9 = arith.constant 0 : index
    %7 = vector.load %arg2[%c0_7, %c1, %c0_8, %c0_9] : memref<2x4x2x128xf32, #tpu.memory_space<vmem>>, vector<2x1x2x128xf32>
    %8 = vector.shape_cast %7 : vector<2x1x2x128xf32> to vector<2x2x128xf32>
    %9 = arith.maximumf %6, %8 : vector<2x2x128xf32>
    %c0_10 = arith.constant 0 : index
    %c2 = arith.constant 2 : index
    %c0_11 = arith.constant 0 : index
    %c0_12 = arith.constant 0 : index
    %10 = vector.load %arg2[%c0_10, %c2, %c0_11, %c0_12] : memref<2x4x2x128xf32, #tpu.memory_space<vmem>>, vector<2x1x2x128xf32>
    %11 = vector.shape_cast %10 : vector<2x1x2x128xf32> to vector<2x2x128xf32>
    %12 = arith.maximumf %9, %11 : vector<2x2x128xf32>
    %c0_13 = arith.constant 0 : index
    %c3 = arith.constant 3 : index
    %c0_14 = arith.constant 0 : index
    %c0_15 = arith.constant 0 : index
    %13 = vector.load %arg2[%c0_13, %c3, %c0_14, %c0_15] : memref<2x4x2x128xf32, #tpu.memory_space<vmem>>, vector<2x1x2x128xf32>
    %14 = vector.shape_cast %13 : vector<2x1x2x128xf32> to vector<2x2x128xf32>
    %15 = arith.maximumf %12, %14 : vector<2x2x128xf32>
    %cst = arith.constant 0.000000e+00 : f32
    %16 = vector.broadcast %cst : f32 to vector<2x2x128xf32>
    %cst_16 = arith.constant 0.000000e+00 : f32
    %17 = vector.broadcast %cst_16 : f32 to vector<2x2x128xf32>
    %c0_17 = arith.constant 0 : index
    %c0_18 = arith.constant 0 : index
    %c0_19 = arith.constant 0 : index
    %c0_20 = arith.constant 0 : index
    %18 = vector.load %arg2[%c0_17, %c0_18, %c0_19, %c0_20] : memref<2x4x2x128xf32, #tpu.memory_space<vmem>>, vector<2x1x2x128xf32>
    %19 = vector.shape_cast %18 : vector<2x1x2x128xf32> to vector<2x2x128xf32>
    %20 = arith.subf %19, %15 : vector<2x2x128xf32>
    %21 = math.exp %20 : vector<2x2x128xf32>
    %22 = arith.addf %16, %21 : vector<2x2x128xf32>
    %c0_i32_21 = arith.constant 0 : i32
    %23 = vector.broadcast %c0_i32_21 : i32 to vector<2x2x128xi32>
    %24 = arith.cmpi eq, %4, %23 : vector<2x2x128xi32>
    %cst_22 = arith.constant 0.000000e+00 : f32
    %25 = vector.broadcast %cst_22 : f32 to vector<2x2x128xf32>
    %26 = arith.select %24, %21, %25 : vector<2x2x128xi1>, vector<2x2x128xf32>
    %27 = arith.addf %17, %26 : vector<2x2x128xf32>
    %c0_23 = arith.constant 0 : index
    %c1_24 = arith.constant 1 : index
    %c0_25 = arith.constant 0 : index
    %c0_26 = arith.constant 0 : index
    %28 = vector.load %arg2[%c0_23, %c1_24, %c0_25, %c0_26] : memref<2x4x2x128xf32, #tpu.memory_space<vmem>>, vector<2x1x2x128xf32>
    %29 = vector.shape_cast %28 : vector<2x1x2x128xf32> to vector<2x2x128xf32>
    %30 = arith.subf %29, %15 : vector<2x2x128xf32>
    %31 = math.exp %30 : vector<2x2x128xf32>
    %32 = arith.addf %22, %31 : vector<2x2x128xf32>
    %c1_i32 = arith.constant 1 : i32
    %33 = vector.broadcast %c1_i32 : i32 to vector<2x2x128xi32>
    %34 = arith.cmpi eq, %4, %33 : vector<2x2x128xi32>
    %cst_27 = arith.constant 0.000000e+00 : f32
    %35 = vector.broadcast %cst_27 : f32 to vector<2x2x128xf32>
    %36 = arith.select %34, %31, %35 : vector<2x2x128xi1>, vector<2x2x128xf32>
    %37 = arith.addf %27, %36 : vector<2x2x128xf32>
    %c0_28 = arith.constant 0 : index
    %c2_29 = arith.constant 2 : index
    %c0_30 = arith.constant 0 : index
    %c0_31 = arith.constant 0 : index
    %38 = vector.load %arg2[%c0_28, %c2_29, %c0_30, %c0_31] : memref<2x4x2x128xf32, #tpu.memory_space<vmem>>, vector<2x1x2x128xf32>
    %39 = vector.shape_cast %38 : vector<2x1x2x128xf32> to vector<2x2x128xf32>
    %40 = arith.subf %39, %15 : vector<2x2x128xf32>
    %41 = math.exp %40 : vector<2x2x128xf32>
    %42 = arith.addf %32, %41 : vector<2x2x128xf32>
    %c2_i32 = arith.constant 2 : i32
    %43 = vector.broadcast %c2_i32 : i32 to vector<2x2x128xi32>
    %44 = arith.cmpi eq, %4, %43 : vector<2x2x128xi32>
    %cst_32 = arith.constant 0.000000e+00 : f32
    %45 = vector.broadcast %cst_32 : f32 to vector<2x2x128xf32>
    %46 = arith.select %44, %41, %45 : vector<2x2x128xi1>, vector<2x2x128xf32>
    %47 = arith.addf %37, %46 : vector<2x2x128xf32>
    %c0_33 = arith.constant 0 : index
    %c3_34 = arith.constant 3 : index
    %c0_35 = arith.constant 0 : index
    %c0_36 = arith.constant 0 : index
    %48 = vector.load %arg2[%c0_33, %c3_34, %c0_35, %c0_36] : memref<2x4x2x128xf32, #tpu.memory_space<vmem>>, vector<2x1x2x128xf32>
    %49 = vector.shape_cast %48 : vector<2x1x2x128xf32> to vector<2x2x128xf32>
    %50 = arith.subf %49, %15 : vector<2x2x128xf32>
    %51 = math.exp %50 : vector<2x2x128xf32>
    %52 = arith.addf %42, %51 : vector<2x2x128xf32>
    %c3_i32 = arith.constant 3 : i32
    %53 = vector.broadcast %c3_i32 : i32 to vector<2x2x128xi32>
    %54 = arith.cmpi eq, %4, %53 : vector<2x2x128xi32>
    %cst_37 = arith.constant 0.000000e+00 : f32
    %55 = vector.broadcast %cst_37 : f32 to vector<2x2x128xf32>
    %56 = arith.select %54, %51, %55 : vector<2x2x128xi1>, vector<2x2x128xf32>
    %57 = arith.addf %47, %56 : vector<2x2x128xf32>
    %58 = tpu.reciprocal %52 {approx = true} : vector<2x2x128xf32> -> vector<2x2x128xf32>
    %59 = arith.mulf %52, %58 : vector<2x2x128xf32>
    %cst_38 = arith.constant 2.000000e+00 : f32
    %60 = vector.broadcast %cst_38 : f32 to vector<2x2x128xf32>
    %61 = arith.subf %60, %59 : vector<2x2x128xf32>
    %62 = arith.mulf %58, %61 : vector<2x2x128xf32>
    %63 = arith.mulf %57, %62 : vector<2x2x128xf32>
    %c0_39 = arith.constant 0 : index
    %c0_40 = arith.constant 0 : index
    %c0_41 = arith.constant 0 : index
    %64 = vector.load %arg5[%c0_39, %c0_40, %c0_41] : memref<2x2x128xf32, #tpu.memory_space<vmem>>, vector<2x2x128xf32>
    %65 = arith.addf %64, %63 : vector<2x2x128xf32>
    %c0_42 = arith.constant 0 : index
    %c0_43 = arith.constant 0 : index
    %c0_44 = arith.constant 0 : index
    %66 = vector.load %arg5[%c0_42, %c0_43, %c0_44] : memref<2x2x128xf32, #tpu.memory_space<vmem>>, vector<2x2x128xf32>
    tpu.vector_store %arg5[%c0_42, %c0_43, %c0_44], %65 {strides = array<i32>} : memref<2x2x128xf32, #tpu.memory_space<vmem>>, vector<2x2x128xf32>,
    %c0_i32_45 = arith.constant 0 : i32
    %67 = arith.cmpi eq, %arg1, %c0_i32_45 : i32
    %68 = arith.extui %67 : i1 to i32
    %c0_i32_46 = arith.constant 0 : i32
    %69 = arith.cmpi ne, %68, %c0_i32_46 : i32
    scf.if %69 {
      %c0_47 = arith.constant 0 : index
      %c0_48 = arith.constant 0 : index
      %c0_49 = arith.constant 0 : index
      %70 = vector.load %arg5[%c0_47, %c0_48, %c0_49] : memref<2x2x128xf32, #tpu.memory_space<vmem>>, vector<2x2x128xf32>
      %cst_50 = arith.constant dense<0.000000e+00> : vector<2x128xf32>
      %71 = vector.multi_reduction <add>, %70, %cst_50 [1] : vector<2x2x128xf32> to vector<2x128xf32>
      %c0_51 = arith.constant 0 : index
      %c0_52 = arith.constant 0 : index
      %c0_53 = arith.constant 0 : index
      %72 = vector.load %arg4[%c0_51, %c0_52, %c0_53] : memref<1x2x128xf32, #tpu.memory_space<vmem>>, vector<1x2x128xf32>
      %73 = vector.shape_cast %72 : vector<1x2x128xf32> to vector<2x128xf32>
      %74 = vector.shape_cast %71 : vector<2x128xf32> to vector<1x2x128xf32>
      tpu.vector_store %arg4[%c0_51, %c0_52, %c0_53], %74 {strides = array<i32>} : memref<1x2x128xf32, #tpu.memory_space<vmem>>, vector<1x2x128xf32>,
    } else {
    }
    return
  }
  func.func @transform_0(%arg0: i32, %arg1: i32) -> (i32, i32, i32, i32) {
    %c1_i32 = arith.constant 1 : i32
    %0 = arith.muli %arg0, %c1_i32 : i32
    %1 = arith.addi %0, %arg1 : i32
    %c0_i32 = arith.constant 0 : i32
    %c0_i32_0 = arith.constant 0 : i32
    %c0_i32_1 = arith.constant 0 : i32
    %c0_i32_2 = arith.constant 0 : i32
    return %c0_i32, %c0_i32_0, %1, %c0_i32_1 : i32, i32, i32, i32
  }
  func.func @transform_1(%arg0: i32, %arg1: i32) -> (i32, i32, i32) {
    %c1_i32 = arith.constant 1 : i32
    %0 = arith.muli %arg0, %c1_i32 : i32
    %1 = arith.addi %0, %arg1 : i32
    %c0_i32 = arith.constant 0 : i32
    %c0_i32_0 = arith.constant 0 : i32
    %c0_i32_1 = arith.constant 0 : i32
    return %c0_i32, %1, %c0_i32_0 : i32, i32, i32
  }
  func.func @transform_2(%arg0: i32, %arg1: i32) -> (i32, i32, i32) {
    %c0_i32 = arith.constant 0 : i32
    %c0_i32_0 = arith.constant 0 : i32
    %c0_i32_1 = arith.constant 0 : i32
    return %arg0, %c0_i32, %c0_i32_0 : i32, i32, i32
  }
}

</mosaic_0001>

<bundles_post_ra>
// kernel: tpu_custom_call.1
= control target key start
LH: loop header
LB: loop body
LE: loop exit
PB: predicated region body
PF: predicated region fallthrough
CT: control target
= control target key end

     0   :  { %7 = vsyncpa [#allocation4], 0  ;;  %s310_s0 = inlined_call_operand.hbm [shape: f32[2,4,2,128], index: 0, kind: input, shape index: {}]   ;;  %s311_s1 = inlined_call_operand.vmem [shape: s8[2,2,128], index: 1, kind: input, shape index: {}]   ;;  %s312_s2 = inlined_call_operand.hbm [shape: f32[1,2,128], index: 2, kind: output, shape index: {}]  }
   0x1   :  { %8 = vsyncpa [#allocation5], 0  ;;  %s260_s9 = smov [#allocation3]   ;;  %s212_s13 = scalar_lea.hbm %s310_s0, 256 }
   0x2   :  { %s17_s10 = sshll.u32 %s260_s9, 4  ;;  %p213_p0 = scmp.ne.s32.totalorder %s310_s0, %s212_s13  ;;  %s18_s10 = int_to_ptr.vmem [resolvable:$true] %s17_s10 }
   0x3   :  { %p216_p1 = scmp.lt.u32.totalorder %s212_s13, %s310_s0 }
   0x5   :  { %p218_p2 = pnand %p216_p1, %p213_p0 }
   0x7   :  { %221 = shalt.err (!%p218_p2)
}
   0x8   :  { %s222_s18 = scalar_lea.vmem %s18_s10, 256  ;;  %p227_p4 = scmp.lt.s32.totalorder %s18_s10, %s18_s10 }
   0x9   :  { %p223_p3 = scmp.ne.s32.totalorder %s18_s10, %s222_s18  ;;  %p228_p5 = scmp.lt.s32.totalorder %s222_s18, %s222_s18 }
   0xb   :  { %p229_p6 = por %p228_p5, %p227_p4 }
   0xd   :  { %p230_p7 = pnand %p229_p6, %p223_p3 }
   0xf   :  { %233 = shalt.err (!%p230_p7)
}
  0x10   :  { %s261_s19 = smov 32   ;;  %s262_s20 = smov 2  }
  0x11   :  { %23 = dma.hbm_to_vmem [thread:$0]  %s310_s0, 256, %s18_s10, [#allocation4], %s261_s19, %s261_s19, %s262_s20  }
  0x12   :  { %256 = dma.done.wait [#allocation4], 256  }
  0x13   :  { %257 = vsyncadd [#allocation4], 4294967040  ;;  %v263_v0 = vmov 0.0   ;;  %v54_v1 = vld [vmem:[#allocation3] sm:$0x3]  ;;  %vm148_vm8 = vcmask 1041408  }
  0x14   :  { %48 = vst [vmem:[#allocation2] sm:$0x3] %v263_v0  ;;  %49 = vst [vmem:[#allocation2 + $0x2] sm:$0x3] %v263_v0  ;;  %v57_v2 = vld [vmem:[#allocation3 + $0x2] sm:$0x3] }
  0x15   :  { %v59_v3 = vmax.f32 %v54_v1, %v57_v2  ;;  %v62_v4 = vld [vmem:[#allocation3 + $0x4] sm:$0x3]  ;;  %v67_v5 = vld [vmem:[#allocation3 + $0x6] sm:$0x3]  ;;  %v55_v6 = vld [vmem:[#allocation3 + $0x8] sm:$0x3] }
  0x16   :  { %v58_v7 = vld [vmem:[#allocation3 + $0xa] sm:$0x3]  ;;  %v63_v9 = vld [vmem:[#allocation3 + $0xc] sm:$0x3]  ;;  %v68_v12 = vld [vmem:[#allocation3 + $0xe] sm:$0x3] }
  0x17   :  { %v64_v8 = vmax.f32 %v59_v3, %v62_v4  ;;  %v60_v10 = vmax.f32 %v55_v6, %v58_v7  ;;  %v50_v32 = vld [vmem:[%s311_s1] sm:$0x1]  ;;  %v51_v40 = vld [vmem:[%s311_s1 + $0x1] sm:$0x1]  ;;  %s264_s1 = smov [#allocation6]   ;;  %vm165_vm9 = vcmask 1041409  }
  0x18   :  { %v52_v37 = vunpack.c.0.s8 %v50_v32  ;;  %v53_v46 = vunpack.c.0.s8 %v51_v40  ;;  %s175_s26 = sshll.u32 %s264_s1, 4  ;;  %s176_s26 = int_to_ptr.vmem [resolvable:$true] %s175_s26 }
  0x19   :  { %v69_v11 = vmax.f32 %v64_v8, %v67_v5  ;;  %v65_v13 = vmax.f32 %v60_v10, %v63_v9  ;;  %s234_s27 = scalar_lea.vmem %s176_s26, 32  ;;  %p239_p9 = scmp.lt.s32.totalorder %s176_s26, %s176_s26 }
  0x1a   :  { %vm79_vm0 = vcmp.eq.s32.totalorder %v52_v37, 0  ;;  %vm93_vm1 = vcmp.eq.s32.totalorder %v52_v37, 1  ;;  %vm107_vm2 = vcmp.eq.s32.totalorder %v52_v37, 2  ;;  %vm80_vm3 = vcmp.eq.s32.totalorder %v53_v46, 0  ;;  %p235_p8 = scmp.ne.s32.totalorder %s176_s26, %s234_s27  ;;  %p240_p10 = scmp.lt.s32.totalorder %s234_s27, %s234_s27 }
  0x1b   :  { %v71_v14 = vsub.f32 %v54_v1, %v69_v11  ;;  %v85_v15 = vsub.f32 %v57_v2, %v69_v11  ;;  %v99_v16 = vsub.f32 %v62_v4, %v69_v11  ;;  %v113_v17 = vsub.f32 %v67_v5, %v69_v11  ;;  %v137_v4 = vld [vmem:[#allocation2] sm:$0x3]  ;;  %v138_v10 = vld [vmem:[#allocation2 + $0x2] sm:$0x3] }
  0x1c   :  { %v70_v18 = vmax.f32 %v65_v13, %v68_v12  ;;  %vm94_vm4 = vcmp.eq.s32.totalorder %v53_v46, 1  ;;  %vm121_vm5 = vcmp.eq.s32.totalorder %v52_v37, 3  ;;  %vm108_vm6 = vcmp.eq.s32.totalorder %v53_v46, 2  ;;  %p241_p11 = por %p240_p10, %p239_p9 }
  0x1d   :  { %v73_v19 = vmul.f32 1.442695, %v71_v14  ;;  %v87_v20 = vmul.f32 1.442695, %v85_v15  ;;  %v101_v21 = vmul.f32 1.442695, %v99_v16 }
  0x1e   :  { %v115_v22 = vmul.f32 1.442695, %v113_v17  ;;  %v72_v23 = vsub.f32 %v55_v6, %v70_v18  ;;  %v86_v24 = vsub.f32 %v58_v7, %v70_v18  ;;  %v100_v25 = vsub.f32 %v63_v9, %v70_v18  ;;  %p242_p12 = pnand %p241_p11, %p235_p8 }
  0x1f   :  { %192 = vpow2.f32 %v73_v19  ;;  %v114_v26 = vsub.f32 %v68_v12, %v70_v18  ;;  %vm122_vm7 = vcmp.eq.s32.totalorder %v53_v46, 3 }
  0x20   :  { %194 = vpow2.f32 %v87_v20  ;;  %v75_v27 = vmul.f32 1.442695, %v72_v23  ;;  %v89_v28 = vmul.f32 1.442695, %v86_v24  ;;  %v103_v29 = vmul.f32 1.442695, %v100_v25 }
  0x21   :  { %196 = vpow2.f32 %v101_v21  ;;  %v117_v30 = vmul.f32 1.442695, %v114_v26 }
  0x22   :  { %198 = vpow2.f32 %v115_v22 }
  0x23   :  { %200 = vpow2.f32 %v75_v27 }
  0x24   :  { %202 = vpow2.f32 %v89_v28 }
  0x25   :  { %204 = vpow2.f32 %v103_v29 }
  0x26   :  { %206 = vpow2.f32 %v117_v30 }
  0x29   :  { %v193_v31 = vpop.eup %192 }
  0x2a   :  { %v195_v33 = vpop.eup %194  ;;  %v81_v48 = vsel %vm79_vm0, %v193_v31, 0.0 }
  0x2b   :  { %v197_v34 = vpop.eup %196  ;;  %v91_v35 = vadd.f32 %v195_v33, %v193_v31  ;;  %v95_v49 = vsel %vm93_vm1, %v195_v33, 0.0 }
  0x2c   :  { %v199_v36 = vpop.eup %198  ;;  %v97_v51 = vadd.f32 %v95_v49, %v81_v48  ;;  %v109_v52 = vsel %vm107_vm2, %v197_v34, 0.0 }
  0x2d   :  { %v201_v38 = vpop.eup %200  ;;  %v105_v39 = vadd.f32 %v197_v34, %v91_v35  ;;  %v123_v58 = vsel %vm121_vm5, %v199_v36, 0.0 }
  0x2e   :  { %v203_v41 = vpop.eup %202  ;;  %v82_v53 = vsel %vm80_vm3, %v201_v38, 0.0  ;;  %v111_v55 = vadd.f32 %v109_v52, %v97_v51 }
  0x2f   :  { %v205_v42 = vpop.eup %204  ;;  %v119_v43 = vadd.f32 %v199_v36, %v105_v39  ;;  %v92_v44 = vadd.f32 %v203_v41, %v201_v38  ;;  %v96_v54 = vsel %vm94_vm4, %v203_v41, 0.0 }
  0x30   :  { %v207_v45 = vpop.eup %206  ;;  %v98_v56 = vadd.f32 %v96_v54, %v82_v53  ;;  %v110_v59 = vsel %vm108_vm6, %v205_v42, 0.0  ;;  %v125_v61 = vadd.f32 %v123_v58, %v111_v55 }
  0x31   :  { %208 = vrcp.f32 %v119_v43  ;;  %v106_v47 = vadd.f32 %v205_v42, %v92_v44  ;;  %v124_v1 = vsel %vm122_vm7, %v207_v45, 0.0 }
  0x32   :  { %v112_v63 = vadd.f32 %v110_v59, %v98_v56 }
  0x33   :  { %v120_v50 = vadd.f32 %v207_v45, %v106_v47 }
  0x34   :  { %v126_v6 = vadd.f32 %v124_v1, %v112_v63 }
  0x35   :  { %210 = vrcp.f32 %v120_v50 }
  0x3b   :  { %v209_v57 = vpop.eup %208 }
  0x3c   :  { %v129_v60 = vmul.f32 %v209_v57, %v119_v43 }
  0x3e   :  { %v131_v62 = vsub.f32 2.0, %v129_v60 }
  0x3f   :  { %v211_v0 = vpop.eup %210 }
  0x40   :  { %v133_v2 = vmul.f32 %v209_v57, %v131_v62  ;;  %v130_v3 = vmul.f32 %v211_v0, %v120_v50 }
  0x42   :  { %v135_v5 = vmul.f32 %v133_v2, %v125_v61  ;;  %v132_v7 = vsub.f32 2.0, %v130_v3 }
  0x44   :  { %v139_v8 = vadd.f32 %v137_v4, %v135_v5  ;;  %v134_v9 = vmul.f32 %v211_v0, %v132_v7 }
  0x46   :  { %141 = vst [vmem:[#allocation2] sm:$0x3] %v139_v8  ;;  %v136_v11 = vmul.f32 %v134_v9, %v126_v6 }
  0x48   :  { %v140_v12 = vadd.f32 %v138_v10, %v136_v11 }
  0x4a   :  { %142 = vst [vmem:[#allocation2 + $0x2] sm:$0x3] %v140_v12 }
  0x4d   :  { %v146_v13 = vld [vmem:[#allocation2] sm:$0x3] }
  0x4e   :  { %v149_v14 = vsel %vm148_vm8, %v146_v13, 0.0 }
  0x4f   :  { %v150_v15 = vrot.slane %v149_v14, 4 }
  0x51   :  { %v147_v16 = vld [vmem:[#allocation2 + $0x2] sm:$0x3]  ;;  %v151_v17 = vadd.f32 %v150_v15, %v149_v14 }
  0x52   :  { %v156_v18 = vsel %vm148_vm8, %v147_v16, 0.0 }
  0x53   :  { %v152_v19 = vrot.slane %v151_v17, 2  ;;  %v157_v20 = vrot.slane %v156_v18, 4 }
  0x55   :  { %v153_v21 = vadd.f32 %v152_v19, %v151_v17  ;;  %v158_v22 = vadd.f32 %v157_v20, %v156_v18 }
  0x57   :  { %v154_v23 = vrot.slane %v153_v21, 1  ;;  %v159_v24 = vrot.slane %v158_v22, 2 }
  0x59   :  { %v160_v25 = vadd.f32 %v159_v24, %v158_v22  ;;  %v155_v26 = vadd.f32 %v154_v23, %v153_v21 }
  0x5b   :  { %v161_v27 = vrot.slane %v160_v25, 1 }
  0x5d   :  { %v162_v28 = vadd.f32 %v161_v27, %v160_v25 }
  0x5f   :  { %v166_v29 = vsel %vm165_vm9, %v162_v28, %v155_v26 }
  0x60   :  { %168 = vst [vmem:[#allocation6] sm:$0x3] %v166_v29 }
  0x61   :  { %245 = shalt.err (!%p242_p12)
}
  0x62   :  { %s246_s30 = scalar_lea.hbm %s312_s2, 32 }
  0x63   :  { %p247_p13 = scmp.ne.s32.totalorder %s312_s2, %s246_s30  ;;  %p250_p0 = scmp.lt.u32.totalorder %s246_s30, %s312_s2 }
  0x65   :  { %p252_p1 = pnand %p250_p0, %p247_p13 }
  0x67   :  { %255 = shalt.err (!%p252_p1)
}
  0x68   :  { %178 = dma.vmem_to_hbm [thread:$0]  %s176_s26, 32, %s312_s2, [#allocation5]  }
  0x69   :  { %258 = dma.done.wait [#allocation5], 32  }
  0x6a   :  { %259 = vsyncadd [#allocation5], 4294967264 }
  0x6b   :  { %182 = vsyncpa [#allocation4], 1 }
  0x6c   :  { %183 = vsyncpa [#allocation5], 1 }

</bundles_post_ra>
